<compile_context>
chip_gen: v5e
topology: v5e:2x2
jax: 0.10.0
libtpu: 0.0.40
codegen_flags: <defaults>
</compile_context>

<pallas_src>
import functools
import math

import jax
import jax.numpy as jnp
from jax import lax
from jax.experimental import pallas as pl
from jax.experimental.pallas import tpu as pltpu


def _round_up(x, m):
    return ((x + m - 1) // m) * m


def _vmem_limit_bytes():
    """Per-generation scoped-VMEM limit: ~3/4 of physical capacity.

    v5e/v6e (128 MiB phys) -> 96 MiB, v7x (64 MiB phys) -> 48 MiB.
    Falls back to a conservative 48 MiB if the query is unavailable.
    """
    try:
        cap = getattr(pltpu.get_tpu_info(), "vmem_capacity_bytes", 0)
        if cap:
            return int(cap * 3 // 4)
    except Exception:
        pass
    return 48 * 1024 * 1024


# ---------------------------------------------------------------------------
# Kernels 1 & 3: weight-resident matmul, grid over row tiles only.
# No K-reduction axis -> no f32 scratch accumulator, no pl.when init/finalize,
# ~10x fewer grid steps than a K-tiled grid for ViT-sized weights.
# ---------------------------------------------------------------------------
def _linear_kernel(x_ref, w_ref, o_ref):
    acc = jnp.dot(x_ref[...].astype(jnp.bfloat16), w_ref[...],
                  preferred_element_type=jnp.float32)
    o_ref[...] = acc.astype(o_ref.dtype)


def _linear_bias_kernel(x_ref, w_ref, b_ref, o_ref):
    acc = jnp.dot(x_ref[...].astype(jnp.bfloat16), w_ref[...],
                  preferred_element_type=jnp.float32)
    o_ref[...] = (acc + b_ref[...]).astype(o_ref.dtype)


def _linear(x2d, w_bf16, bias=None, *, out_dtype, vmem_limit, tm=256):
    M, K = x2d.shape
    K2, N = w_bf16.shape
    assert K == K2
    # Row tile aligned to 16 (bf16 sublane tile, also a multiple of 8 for f32);
    # pad M up to the tile size rather than shrinking the tile to a divisor.
    tm = min(tm, _round_up(M, 16))
    m_pad = _round_up(M, tm)
    if m_pad != M:
        x2d = jnp.pad(x2d, ((0, m_pad - M), (0, 0)))
    grid = (m_pad // tm,)

    cost = pl.CostEstimate(
        flops=2 * m_pad * N * K,
        transcendentals=0,
        bytes_accessed=(m_pad * K * x2d.dtype.itemsize + K * N * 2
                        + m_pad * N * jnp.dtype(out_dtype).itemsize),
    )
    cp = pltpu.CompilerParams(
        dimension_semantics=("parallel",),
        vmem_limit_bytes=vmem_limit,
    )

    x_spec = pl.BlockSpec((tm, K), lambda i: (i, 0))
    w_spec = pl.BlockSpec((K, N), lambda i: (0, 0))   # resident: DMA'd once
    o_spec = pl.BlockSpec((tm, N), lambda i: (i, 0))

    if bias is None:
        out = pl.pallas_call(
            _linear_kernel,
            out_shape=jax.ShapeDtypeStruct((m_pad, N), out_dtype),
            grid_spec=pltpu.PrefetchScalarGridSpec(
                num_scalar_prefetch=0, grid=grid,
                in_specs=[x_spec, w_spec], out_specs=o_spec),
            compiler_params=cp, cost_estimate=cost,
        )(x2d, w_bf16)
    else:
        b_spec = pl.BlockSpec((1, N), lambda i: (0, 0))
        out = pl.pallas_call(
            _linear_bias_kernel,
            out_shape=jax.ShapeDtypeStruct((m_pad, N), out_dtype),
            grid_spec=pltpu.PrefetchScalarGridSpec(
                num_scalar_prefetch=0, grid=grid,
                in_specs=[x_spec, w_spec, b_spec], out_specs=o_spec),
            compiler_params=cp, cost_estimate=cost,
        )(x2d, w_bf16, bias.reshape(1, N).astype(jnp.float32))
    return out[:M] if m_pad != M else out


# ---------------------------------------------------------------------------
# Kernel 2: attention for one (batch, head-group), lane-dense per-head stores.
# ---------------------------------------------------------------------------
def _attention_kernel(q_ref, k_ref, v_ref, o_ref, *, heads_per_group, head_dim):
    # q/k/v refs: (1, N, heads_per_group*head_dim) bf16 column slabs of the
    # fused qkv activation. 1/sqrt(Dh) is already folded into q via the weight.
    for h in range(heads_per_group):
        lo = h * head_dim
        hi = lo + head_dim
        q = q_ref[0, :, lo:hi]
        k = k_ref[0, :, lo:hi]
        v = v_ref[0, :, lo:hi]
        # QK^T contracting the last dims of both operands (same pattern as the
        # reference flash kernel): bf16 MXU operands, f32 scores.
        s = lax.dot_general(q, k, (((1,), (1,)), ((), ())),
                            preferred_element_type=jnp.float32)     # (N, N)
        s = s - jnp.max(s, axis=-1, keepdims=True)
        p = jnp.exp(s)
        denom = jnp.sum(p, axis=-1, keepdims=True)
        # attention dropout: identity (eval mode)
        o_h = jnp.dot(p.astype(jnp.bfloat16), v,
                      preferred_element_type=jnp.float32)            # (N, Dh)
        # Normalize AFTER the PV matmul: N*Dh exact divides instead of N*N
        # multiplies on the score matrix (also removes the approx-recip error).
        o_ref[0, :, lo:hi] = (o_h / denom).astype(o_ref.dtype)


# ---------------------------------------------------------------------------
# Wrapper: full MultiHeadAttention forward
# ---------------------------------------------------------------------------
def multi_head_attention(x, w_qkv, w_proj, b_proj, *, num_heads):
    B, N, D = x.shape
    head_dim = D // num_heads
    assert num_heads * head_dim == D
    assert D % 128 == 0, "lane-aligned head grouping requires dim % 128 == 0"
    scale = 1.0 / math.sqrt(head_dim)
    vmem_limit = _vmem_limit_bytes()

    # Trace-time weight prep (free): fold the softmax scale into the Q columns
    # and cast weights to bf16 for the MXU.
    w_qkv_bf16 = jnp.concatenate(
        [w_qkv[:, :D] * scale, w_qkv[:, D:]], axis=1).astype(jnp.bfloat16)
    w_proj_bf16 = w_proj.astype(jnp.bfloat16)

    # ---- 1) fused QKV projection (no bias), bf16 activation output ---------
    qkv = _linear(x.reshape(B * N, D), w_qkv_bf16,
                  out_dtype=jnp.bfloat16, vmem_limit=vmem_limit)
    qkv = qkv.reshape(B, N, 3 * D)          # contiguous -> free reshape
    # Column layout is torch's reshape(B,N,3,H,Dh): [qkv(3), head(H), Dh].

    # ---- 2) attention: grid (batch, head_group), both axes parallel --------
    # Heads are processed in groups whose fused lane width is a multiple of
    # 128 so every BlockSpec slab is lane-aligned (no sub-128 block dims).
    m = 128 // math.gcd(head_dim, 128)      # min heads per 128-aligned slab
    hg = m
    while hg < num_heads and num_heads % hg != 0:
        hg += m
    if num_heads % hg != 0:
        hg = num_heads                      # slab = D, still 128-aligned
    G = num_heads // hg
    slab = hg * head_dim

    q_spec = pl.BlockSpec((1, N, slab), lambda b, g: (b, 0, g))
    k_spec = pl.BlockSpec((1, N, slab), lambda b, g: (b, 0, G + g))
    v_spec = pl.BlockSpec((1, N, slab), lambda b, g: (b, 0, 2 * G + g))
    o_spec = pl.BlockSpec((1, N, slab), lambda b, g: (b, 0, g))

    attn = pl.pallas_call(
        functools.partial(_attention_kernel, heads_per_group=hg,
                          head_dim=head_dim),
        out_shape=jax.ShapeDtypeStruct((B, N, D), jnp.bfloat16),
        grid_spec=pltpu.PrefetchScalarGridSpec(
            num_scalar_prefetch=0,
            grid=(B, G),
            in_specs=[q_spec, k_spec, v_spec],
            out_specs=o_spec,
        ),
        compiler_params=pltpu.CompilerParams(
            dimension_semantics=("parallel", "parallel"),
            vmem_limit_bytes=vmem_limit,
        ),
        cost_estimate=pl.CostEstimate(
            flops=4 * B * num_heads * N * N * head_dim,
            transcendentals=B * num_heads * N * N,
            bytes_accessed=2 * (3 * B * N * D + B * N * D),
        ),
    )(qkv, qkv, qkv)
    # Output columns are already in torch's transpose(1,2).reshape(B,N,D) order.

    # ---- 3) output projection with bias, f32 (input dtype) output ----------
    out = _linear(attn.reshape(B * N, D), w_proj_bf16, b_proj,
                  out_dtype=x.dtype, vmem_limit=vmem_limit)
    return out.reshape(B, N, D)


# ---------------------------------------------------------------------------
# Pure-JAX reference (mirrors the PyTorch forward, dropout in eval mode)
# ---------------------------------------------------------------------------
def reference_mha(x, w_qkv, w_proj, b_proj, *, num_heads):
    B, N, D = x.shape
    head_dim = D // num_heads
    scale = 1.0 / math.sqrt(head_dim)
    qkv = x @ w_qkv
    qkv = qkv.reshape(B, N, 3, num_heads, head_dim)
    qkv = jnp.transpose(qkv, (2, 0, 3, 1, 4))
    q, k, v = qkv[0], qkv[1], qkv[2]
    s = jnp.einsum("bhqd,bhkd->bhqk", q, k) * scale
    p = jax.nn.softmax(s, axis=-1)
    o = jnp.einsum("bhqk,bhkd->bhqd", p, v)
    o = jnp.transpose(o, (0, 2, 1, 3)).reshape(B, N, D)
    return o @ w_proj + b_proj


if __name__ == "__main__":
    # Small shapes consistent with the module (dim divisible by num_heads).
    B, N, D, H = 2, 16, 128, 4

    key = jax.random.PRNGKey(0)
    kx, kw1, kw2, kb = jax.random.split(key, 4)

    x = jax.random.normal(kx, (B, N, D), dtype=jnp.float32)
    # Linear weights stored as (in, out); proj has a bias.
    w_qkv = jax.random.normal(kw1, (D, 3 * D), dtype=jnp.float32) * 0.02
    w_proj = jax.random.normal(kw2, (D, D), dtype=jnp.float32) * 0.02
    b_proj = jax.random.normal(kb, (D,), dtype=jnp.float32) * 0.02

    mha = jax.jit(functools.partial(multi_head_attention, num_heads=H))
    out = jax.block_until_ready(mha(x, w_qkv, w_proj, b_proj))

    ref = reference_mha(x, w_qkv, w_proj, b_proj, num_heads=H)
    assert out.shape == (B, N, D)
    # Tolerance covers bf16 MXU operands / bf16 intermediate activations.
    assert jnp.allclose(out, ref, atol=1e-2, rtol=1e-2), "mismatch vs reference"

    print("KERNEL_OK")
</pallas_src>

<mosaic_0001>
module attributes {stable_mosaic.version = 11 : i64} {
  func.func @_linear_kernel(%arg0: i32, %arg1: memref<32x128xf32, #tpu.memory_space<vmem>>, %arg2: memref<128x384xbf16, #tpu.memory_space<vmem>>, %arg3: memref<32x384xbf16, #tpu.memory_space<vmem>>) attributes {dimension_semantics = [#tpu.dimension_semantics<parallel>], iteration_bounds = array<i64: 1>, scalar_prefetch = 0 : i64, scratch_operands = 0 : i64, tpu.core_type = #tpu.core_type<tc>, window_params = [{transform_indices = @transform_0, window_bounds = array<i64: 32, 128>}, {pipeline_mode = #tpu.pipeline_mode<synchronous>, transform_indices = @transform_1, window_bounds = array<i64: 128, 384>}, {transform_indices = @transform_2, window_bounds = array<i64: 32, 384>}]} {
    %c0 = arith.constant 0 : index
    %c0_0 = arith.constant 0 : index
    %0 = vector.load %arg1[%c0, %c0_0] : memref<32x128xf32, #tpu.memory_space<vmem>>, vector<32x128xf32>
    %1 = arith.truncf %0 : vector<32x128xf32> to vector<32x128xbf16>
    %c0_1 = arith.constant 0 : index
    %c0_2 = arith.constant 0 : index
    %2 = vector.load %arg2[%c0_1, %c0_2] : memref<128x384xbf16, #tpu.memory_space<vmem>>, vector<128x384xbf16>
    %cst = arith.constant dense<0.000000e+00> : vector<32x384xf32>
    %3 = tpu.matmul %1, %2, %cst {dimension_numbers = #tpu.dot_dimension_numbers<[1], [0], [0], [1], [0, 0, 1, 1], [], []>} : vector<32x128xbf16>, vector<128x384xbf16>, vector<32x384xf32> -> vector<32x384xf32>
    %4 = arith.truncf %3 : vector<32x384xf32> to vector<32x384xbf16>
    %c0_3 = arith.constant 0 : index
    %c0_4 = arith.constant 0 : index
    %5 = vector.load %arg3[%c0_3, %c0_4] : memref<32x384xbf16, #tpu.memory_space<vmem>>, vector<32x384xbf16>
    tpu.vector_store %arg3[%c0_3, %c0_4], %4 {strides = array<i32>} : memref<32x384xbf16, #tpu.memory_space<vmem>>, vector<32x384xbf16>,
    return
  }
  func.func @transform_0(%arg0: i32) -> (i32, i32) {
    %c0_i32 = arith.constant 0 : i32
    %c0_i32_0 = arith.constant 0 : i32
    return %arg0, %c0_i32 : i32, i32
  }
  func.func @transform_1(%arg0: i32) -> (i32, i32) {
    %c0_i32 = arith.constant 0 : i32
    %c0_i32_0 = arith.constant 0 : i32
    %c0_i32_1 = arith.constant 0 : i32
    return %c0_i32, %c0_i32_0 : i32, i32
  }
  func.func @transform_2(%arg0: i32) -> (i32, i32) {
    %c0_i32 = arith.constant 0 : i32
    %c0_i32_0 = arith.constant 0 : i32
    return %arg0, %c0_i32 : i32, i32
  }
}

module attributes {stable_mosaic.version = 11 : i64} {
  func.func @_attention_kernel(%arg0: i32, %arg1: i32, %arg2: memref<1x16x128xbf16, #tpu.memory_space<vmem>>, %arg3: memref<1x16x128xbf16, #tpu.memory_space<vmem>>, %arg4: memref<1x16x128xbf16, #tpu.memory_space<vmem>>, %arg5: memref<1x16x128xbf16, #tpu.memory_space<vmem>>) attributes {dimension_semantics = [#tpu.dimension_semantics<parallel>, #tpu.dimension_semantics<parallel>], iteration_bounds = array<i64: 2, 1>, scalar_prefetch = 0 : i64, scratch_operands = 0 : i64, tpu.core_type = #tpu.core_type<tc>, window_params = [{transform_indices = @transform_0, window_bounds = array<i64: 1, 16, 128>}, {transform_indices = @transform_1, window_bounds = array<i64: 1, 16, 128>}, {transform_indices = @transform_2, window_bounds = array<i64: 1, 16, 128>}, {transform_indices = @transform_3, window_bounds = array<i64: 1, 16, 128>}]} {
    %c0 = arith.constant 0 : index
    %c0_0 = arith.constant 0 : index
    %c0_1 = arith.constant 0 : index
    %0 = vector.load %arg2[%c0, %c0_0, %c0_1] : memref<1x16x128xbf16, #tpu.memory_space<vmem>>, vector<1x16x32xbf16>
    %1 = vector.shape_cast %0 : vector<1x16x32xbf16> to vector<16x32xbf16>
    %c0_2 = arith.constant 0 : index
    %c0_3 = arith.constant 0 : index
    %c0_4 = arith.constant 0 : index
    %2 = vector.load %arg3[%c0_2, %c0_3, %c0_4] : memref<1x16x128xbf16, #tpu.memory_space<vmem>>, vector<1x16x32xbf16>
    %3 = vector.shape_cast %2 : vector<1x16x32xbf16> to vector<16x32xbf16>
    %c0_5 = arith.constant 0 : index
    %c0_6 = arith.constant 0 : index
    %c0_7 = arith.constant 0 : index
    %4 = vector.load %arg4[%c0_5, %c0_6, %c0_7] : memref<1x16x128xbf16, #tpu.memory_space<vmem>>, vector<1x16x32xbf16>
    %5 = vector.shape_cast %4 : vector<1x16x32xbf16> to vector<16x32xbf16>
    %cst = arith.constant dense<0.000000e+00> : vector<16x16xf32>
    %6 = tpu.matmul %1, %3, %cst {dimension_numbers = #tpu.dot_dimension_numbers<[1], [1], [0], [0], [0, 0, 1, 0], [], []>} : vector<16x32xbf16>, vector<16x32xbf16>, vector<16x16xf32> -> vector<16x16xf32>
    %cst_8 = arith.constant dense<0xFF800000> : vector<16xf32>
    %7 = vector.multi_reduction <maximumf>, %6, %cst_8 [1] : vector<16x16xf32> to vector<16xf32>
    %8 = vector.shape_cast %7 : vector<16xf32> to vector<16x1xf32>
    %9 = vector.broadcast %8 : vector<16x1xf32> to vector<16x16xf32>
    %10 = arith.subf %6, %9 : vector<16x16xf32>
    %11 = math.exp %10 : vector<16x16xf32>
    %cst_9 = arith.constant dense<0.000000e+00> : vector<16xf32>
    %12 = vector.multi_reduction <add>, %11, %cst_9 [1] : vector<16x16xf32> to vector<16xf32>
    %13 = vector.shape_cast %12 : vector<16xf32> to vector<16x1xf32>
    %14 = arith.truncf %11 : vector<16x16xf32> to vector<16x16xbf16>
    %cst_10 = arith.constant dense<0.000000e+00> : vector<16x32xf32>
    %15 = tpu.matmul %14, %5, %cst_10 {dimension_numbers = #tpu.dot_dimension_numbers<[1], [0], [0], [1], [0, 0, 1, 1], [], []>} : vector<16x16xbf16>, vector<16x32xbf16>, vector<16x32xf32> -> vector<16x32xf32>
    %16 = vector.broadcast %13 : vector<16x1xf32> to vector<16x32xf32>
    %17 = arith.divf %15, %16 : vector<16x32xf32>
    %18 = arith.truncf %17 : vector<16x32xf32> to vector<16x32xbf16>
    %c0_11 = arith.constant 0 : index
    %c0_12 = arith.constant 0 : index
    %c0_13 = arith.constant 0 : index
    %19 = vector.load %arg5[%c0_11, %c0_12, %c0_13] : memref<1x16x128xbf16, #tpu.memory_space<vmem>>, vector<1x16x32xbf16>
    %20 = vector.shape_cast %19 : vector<1x16x32xbf16> to vector<16x32xbf16>
    %21 = vector.shape_cast %18 : vector<16x32xbf16> to vector<1x16x32xbf16>
    tpu.vector_store %arg5[%c0_11, %c0_12, %c0_13], %21 {strides = array<i32>} : memref<1x16x128xbf16, #tpu.memory_space<vmem>>, vector<1x16x32xbf16>,
    %c0_14 = arith.constant 0 : index
    %c0_15 = arith.constant 0 : index
    %c32 = arith.constant 32 : index
    %22 = vector.load %arg2[%c0_14, %c0_15, %c32] : memref<1x16x128xbf16, #tpu.memory_space<vmem>>, vector<1x16x32xbf16>
    %23 = vector.shape_cast %22 : vector<1x16x32xbf16> to vector<16x32xbf16>
    %c0_16 = arith.constant 0 : index
    %c0_17 = arith.constant 0 : index
    %c32_18 = arith.constant 32 : index
    %24 = vector.load %arg3[%c0_16, %c0_17, %c32_18] : memref<1x16x128xbf16, #tpu.memory_space<vmem>>, vector<1x16x32xbf16>
    %25 = vector.shape_cast %24 : vector<1x16x32xbf16> to vector<16x32xbf16>
    %c0_19 = arith.constant 0 : index
    %c0_20 = arith.constant 0 : index
    %c32_21 = arith.constant 32 : index
    %26 = vector.load %arg4[%c0_19, %c0_20, %c32_21] : memref<1x16x128xbf16, #tpu.memory_space<vmem>>, vector<1x16x32xbf16>
    %27 = vector.shape_cast %26 : vector<1x16x32xbf16> to vector<16x32xbf16>
    %cst_22 = arith.constant dense<0.000000e+00> : vector<16x16xf32>
    %28 = tpu.matmul %23, %25, %cst_22 {dimension_numbers = #tpu.dot_dimension_numbers<[1], [1], [0], [0], [0, 0, 1, 0], [], []>} : vector<16x32xbf16>, vector<16x32xbf16>, vector<16x16xf32> -> vector<16x16xf32>
    %cst_23 = arith.constant dense<0xFF800000> : vector<16xf32>
    %29 = vector.multi_reduction <maximumf>, %28, %cst_23 [1] : vector<16x16xf32> to vector<16xf32>
    %30 = vector.shape_cast %29 : vector<16xf32> to vector<16x1xf32>
    %31 = vector.broadcast %30 : vector<16x1xf32> to vector<16x16xf32>
    %32 = arith.subf %28, %31 : vector<16x16xf32>
    %33 = math.exp %32 : vector<16x16xf32>
    %cst_24 = arith.constant dense<0.000000e+00> : vector<16xf32>
    %34 = vector.multi_reduction <add>, %33, %cst_24 [1] : vector<16x16xf32> to vector<16xf32>
    %35 = vector.shape_cast %34 : vector<16xf32> to vector<16x1xf32>
    %36 = arith.truncf %33 : vector<16x16xf32> to vector<16x16xbf16>
    %cst_25 = arith.constant dense<0.000000e+00> : vector<16x32xf32>
    %37 = tpu.matmul %36, %27, %cst_25 {dimension_numbers = #tpu.dot_dimension_numbers<[1], [0], [0], [1], [0, 0, 1, 1], [], []>} : vector<16x16xbf16>, vector<16x32xbf16>, vector<16x32xf32> -> vector<16x32xf32>
    %38 = vector.broadcast %35 : vector<16x1xf32> to vector<16x32xf32>
    %39 = arith.divf %37, %38 : vector<16x32xf32>
    %40 = arith.truncf %39 : vector<16x32xf32> to vector<16x32xbf16>
    %c0_26 = arith.constant 0 : index
    %c0_27 = arith.constant 0 : index
    %c32_28 = arith.constant 32 : index
    %41 = vector.load %arg5[%c0_26, %c0_27, %c32_28] : memref<1x16x128xbf16, #tpu.memory_space<vmem>>, vector<1x16x32xbf16>
    %42 = vector.shape_cast %41 : vector<1x16x32xbf16> to vector<16x32xbf16>
    %43 = vector.shape_cast %40 : vector<16x32xbf16> to vector<1x16x32xbf16>
    tpu.vector_store %arg5[%c0_26, %c0_27, %c32_28], %43 {strides = array<i32>} : memref<1x16x128xbf16, #tpu.memory_space<vmem>>, vector<1x16x32xbf16>,
    %c0_29 = arith.constant 0 : index
    %c0_30 = arith.constant 0 : index
    %c64 = arith.constant 64 : index
    %44 = vector.load %arg2[%c0_29, %c0_30, %c64] : memref<1x16x128xbf16, #tpu.memory_space<vmem>>, vector<1x16x32xbf16>
    %45 = vector.shape_cast %44 : vector<1x16x32xbf16> to vector<16x32xbf16>
    %c0_31 = arith.constant 0 : index
    %c0_32 = arith.constant 0 : index
    %c64_33 = arith.constant 64 : index
    %46 = vector.load %arg3[%c0_31, %c0_32, %c64_33] : memref<1x16x128xbf16, #tpu.memory_space<vmem>>, vector<1x16x32xbf16>
    %47 = vector.shape_cast %46 : vector<1x16x32xbf16> to vector<16x32xbf16>
    %c0_34 = arith.constant 0 : index
    %c0_35 = arith.constant 0 : index
    %c64_36 = arith.constant 64 : index
    %48 = vector.load %arg4[%c0_34, %c0_35, %c64_36] : memref<1x16x128xbf16, #tpu.memory_space<vmem>>, vector<1x16x32xbf16>
    %49 = vector.shape_cast %48 : vector<1x16x32xbf16> to vector<16x32xbf16>
    %cst_37 = arith.constant dense<0.000000e+00> : vector<16x16xf32>
    %50 = tpu.matmul %45, %47, %cst_37 {dimension_numbers = #tpu.dot_dimension_numbers<[1], [1], [0], [0], [0, 0, 1, 0], [], []>} : vector<16x32xbf16>, vector<16x32xbf16>, vector<16x16xf32> -> vector<16x16xf32>
    %cst_38 = arith.constant dense<0xFF800000> : vector<16xf32>
    %51 = vector.multi_reduction <maximumf>, %50, %cst_38 [1] : vector<16x16xf32> to vector<16xf32>
    %52 = vector.shape_cast %51 : vector<16xf32> to vector<16x1xf32>
    %53 = vector.broadcast %52 : vector<16x1xf32> to vector<16x16xf32>
    %54 = arith.subf %50, %53 : vector<16x16xf32>
    %55 = math.exp %54 : vector<16x16xf32>
    %cst_39 = arith.constant dense<0.000000e+00> : vector<16xf32>
    %56 = vector.multi_reduction <add>, %55, %cst_39 [1] : vector<16x16xf32> to vector<16xf32>
    %57 = vector.shape_cast %56 : vector<16xf32> to vector<16x1xf32>
    %58 = arith.truncf %55 : vector<16x16xf32> to vector<16x16xbf16>
    %cst_40 = arith.constant dense<0.000000e+00> : vector<16x32xf32>
    %59 = tpu.matmul %58, %49, %cst_40 {dimension_numbers = #tpu.dot_dimension_numbers<[1], [0], [0], [1], [0, 0, 1, 1], [], []>} : vector<16x16xbf16>, vector<16x32xbf16>, vector<16x32xf32> -> vector<16x32xf32>
    %60 = vector.broadcast %57 : vector<16x1xf32> to vector<16x32xf32>
    %61 = arith.divf %59, %60 : vector<16x32xf32>
    %62 = arith.truncf %61 : vector<16x32xf32> to vector<16x32xbf16>
    %c0_41 = arith.constant 0 : index
    %c0_42 = arith.constant 0 : index
    %c64_43 = arith.constant 64 : index
    %63 = vector.load %arg5[%c0_41, %c0_42, %c64_43] : memref<1x16x128xbf16, #tpu.memory_space<vmem>>, vector<1x16x32xbf16>
    %64 = vector.shape_cast %63 : vector<1x16x32xbf16> to vector<16x32xbf16>
    %65 = vector.shape_cast %62 : vector<16x32xbf16> to vector<1x16x32xbf16>
    tpu.vector_store %arg5[%c0_41, %c0_42, %c64_43], %65 {strides = array<i32>} : memref<1x16x128xbf16, #tpu.memory_space<vmem>>, vector<1x16x32xbf16>,
    %c0_44 = arith.constant 0 : index
    %c0_45 = arith.constant 0 : index
    %c96 = arith.constant 96 : index
    %66 = vector.load %arg2[%c0_44, %c0_45, %c96] : memref<1x16x128xbf16, #tpu.memory_space<vmem>>, vector<1x16x32xbf16>
    %67 = vector.shape_cast %66 : vector<1x16x32xbf16> to vector<16x32xbf16>
    %c0_46 = arith.constant 0 : index
    %c0_47 = arith.constant 0 : index
    %c96_48 = arith.constant 96 : index
    %68 = vector.load %arg3[%c0_46, %c0_47, %c96_48] : memref<1x16x128xbf16, #tpu.memory_space<vmem>>, vector<1x16x32xbf16>
    %69 = vector.shape_cast %68 : vector<1x16x32xbf16> to vector<16x32xbf16>
    %c0_49 = arith.constant 0 : index
    %c0_50 = arith.constant 0 : index
    %c96_51 = arith.constant 96 : index
    %70 = vector.load %arg4[%c0_49, %c0_50, %c96_51] : memref<1x16x128xbf16, #tpu.memory_space<vmem>>, vector<1x16x32xbf16>
    %71 = vector.shape_cast %70 : vector<1x16x32xbf16> to vector<16x32xbf16>
    %cst_52 = arith.constant dense<0.000000e+00> : vector<16x16xf32>
    %72 = tpu.matmul %67, %69, %cst_52 {dimension_numbers = #tpu.dot_dimension_numbers<[1], [1], [0], [0], [0, 0, 1, 0], [], []>} : vector<16x32xbf16>, vector<16x32xbf16>, vector<16x16xf32> -> vector<16x16xf32>
    %cst_53 = arith.constant dense<0xFF800000> : vector<16xf32>
    %73 = vector.multi_reduction <maximumf>, %72, %cst_53 [1] : vector<16x16xf32> to vector<16xf32>
    %74 = vector.shape_cast %73 : vector<16xf32> to vector<16x1xf32>
    %75 = vector.broadcast %74 : vector<16x1xf32> to vector<16x16xf32>
    %76 = arith.subf %72, %75 : vector<16x16xf32>
    %77 = math.exp %76 : vector<16x16xf32>
    %cst_54 = arith.constant dense<0.000000e+00> : vector<16xf32>
    %78 = vector.multi_reduction <add>, %77, %cst_54 [1] : vector<16x16xf32> to vector<16xf32>
    %79 = vector.shape_cast %78 : vector<16xf32> to vector<16x1xf32>
    %80 = arith.truncf %77 : vector<16x16xf32> to vector<16x16xbf16>
    %cst_55 = arith.constant dense<0.000000e+00> : vector<16x32xf32>
    %81 = tpu.matmul %80, %71, %cst_55 {dimension_numbers = #tpu.dot_dimension_numbers<[1], [0], [0], [1], [0, 0, 1, 1], [], []>} : vector<16x16xbf16>, vector<16x32xbf16>, vector<16x32xf32> -> vector<16x32xf32>
    %82 = vector.broadcast %79 : vector<16x1xf32> to vector<16x32xf32>
    %83 = arith.divf %81, %82 : vector<16x32xf32>
    %84 = arith.truncf %83 : vector<16x32xf32> to vector<16x32xbf16>
    %c0_56 = arith.constant 0 : index
    %c0_57 = arith.constant 0 : index
    %c96_58 = arith.constant 96 : index
    %85 = vector.load %arg5[%c0_56, %c0_57, %c96_58] : memref<1x16x128xbf16, #tpu.memory_space<vmem>>, vector<1x16x32xbf16>
    %86 = vector.shape_cast %85 : vector<1x16x32xbf16> to vector<16x32xbf16>
    %87 = vector.shape_cast %84 : vector<16x32xbf16> to vector<1x16x32xbf16>
    tpu.vector_store %arg5[%c0_56, %c0_57, %c96_58], %87 {strides = array<i32>} : memref<1x16x128xbf16, #tpu.memory_space<vmem>>, vector<1x16x32xbf16>,
    return
  }
  func.func @transform_0(%arg0: i32, %arg1: i32) -> (i32, i32, i32) {
    %c0_i32 = arith.constant 0 : i32
    %c0_i32_0 = arith.constant 0 : i32
    return %arg0, %c0_i32, %arg1 : i32, i32, i32
  }
  func.func @transform_1(%arg0: i32, %arg1: i32) -> (i32, i32, i32) {
    %c1_i32 = arith.constant 1 : i32
    %0 = arith.addi %c1_i32, %arg1 : i32
    %c0_i32 = arith.constant 0 : i32
    %c0_i32_0 = arith.constant 0 : i32
    return %arg0, %c0_i32, %0 : i32, i32, i32
  }
  func.func @transform_2(%arg0: i32, %arg1: i32) -> (i32, i32, i32) {
    %c2_i32 = arith.constant 2 : i32
    %0 = arith.addi %c2_i32, %arg1 : i32
    %c0_i32 = arith.constant 0 : i32
    %c0_i32_0 = arith.constant 0 : i32
    return %arg0, %c0_i32, %0 : i32, i32, i32
  }
  func.func @transform_3(%arg0: i32, %arg1: i32) -> (i32, i32, i32) {
    %c0_i32 = arith.constant 0 : i32
    %c0_i32_0 = arith.constant 0 : i32
    return %arg0, %c0_i32, %arg1 : i32, i32, i32
  }
}

module attributes {stable_mosaic.version = 11 : i64} {
  func.func @_linear_bias_kernel(%arg0: i32, %arg1: memref<32x128xbf16, #tpu.memory_space<vmem>>, %arg2: memref<128x128xbf16, #tpu.memory_space<vmem>>, %arg3: memref<1x128xf32, #tpu.memory_space<vmem>>, %arg4: memref<32x128xf32, #tpu.memory_space<vmem>>) attributes {dimension_semantics = [#tpu.dimension_semantics<parallel>], iteration_bounds = array<i64: 1>, scalar_prefetch = 0 : i64, scratch_operands = 0 : i64, tpu.core_type = #tpu.core_type<tc>, window_params = [{transform_indices = @transform_0, window_bounds = array<i64: 32, 128>}, {pipeline_mode = #tpu.pipeline_mode<synchronous>, transform_indices = @transform_1, window_bounds = array<i64: 128, 128>}, {pipeline_mode = #tpu.pipeline_mode<synchronous>, transform_indices = @transform_2, window_bounds = array<i64: 1, 128>}, {transform_indices = @transform_3, window_bounds = array<i64: 32, 128>}]} {
    %c0 = arith.constant 0 : index
    %c0_0 = arith.constant 0 : index
    %0 = vector.load %arg1[%c0, %c0_0] : memref<32x128xbf16, #tpu.memory_space<vmem>>, vector<32x128xbf16>
    %c0_1 = arith.constant 0 : index
    %c0_2 = arith.constant 0 : index
    %1 = vector.load %arg2[%c0_1, %c0_2] : memref<128x128xbf16, #tpu.memory_space<vmem>>, vector<128x128xbf16>
    %cst = arith.constant dense<0.000000e+00> : vector<32x128xf32>
    %2 = tpu.matmul %0, %1, %cst {dimension_numbers = #tpu.dot_dimension_numbers<[1], [0], [0], [1], [0, 0, 1, 1], [], []>} : vector<32x128xbf16>, vector<128x128xbf16>, vector<32x128xf32> -> vector<32x128xf32>
    %c0_3 = arith.constant 0 : index
    %c0_4 = arith.constant 0 : index
    %3 = vector.load %arg3[%c0_3, %c0_4] : memref<1x128xf32, #tpu.memory_space<vmem>>, vector<1x128xf32>
    %4 = vector.broadcast %3 : vector<1x128xf32> to vector<32x128xf32>
    %5 = arith.addf %2, %4 : vector<32x128xf32>
    %c0_5 = arith.constant 0 : index
    %c0_6 = arith.constant 0 : index
    %6 = vector.load %arg4[%c0_5, %c0_6] : memref<32x128xf32, #tpu.memory_space<vmem>>, vector<32x128xf32>
    tpu.vector_store %arg4[%c0_5, %c0_6], %5 {strides = array<i32>} : memref<32x128xf32, #tpu.memory_space<vmem>>, vector<32x128xf32>,
    return
  }
  func.func @transform_0(%arg0: i32) -> (i32, i32) {
    %c0_i32 = arith.constant 0 : i32
    %c0_i32_0 = arith.constant 0 : i32
    return %arg0, %c0_i32 : i32, i32
  }
  func.func @transform_1(%arg0: i32) -> (i32, i32) {
    %c0_i32 = arith.constant 0 : i32
    %c0_i32_0 = arith.constant 0 : i32
    %c0_i32_1 = arith.constant 0 : i32
    return %c0_i32, %c0_i32_0 : i32, i32
  }
  func.func @transform_2(%arg0: i32) -> (i32, i32) {
    %c0_i32 = arith.constant 0 : i32
    %c0_i32_0 = arith.constant 0 : i32
    %c0_i32_1 = arith.constant 0 : i32
    return %c0_i32, %c0_i32_0 : i32, i32
  }
  func.func @transform_3(%arg0: i32) -> (i32, i32) {
    %c0_i32 = arith.constant 0 : i32
    %c0_i32_0 = arith.constant 0 : i32
    return %arg0, %c0_i32 : i32, i32
  }
}

</mosaic_0001>

<bundles_post_ra>
// kernel: multi_head_attention.5
= control target key start
LH: loop header
LB: loop body
LE: loop exit
PB: predicated region body
PF: predicated region fallthrough
CT: control target
= control target key end

     0   :  { %s287_s0 = inlined_call_operand.vmem [shape: bf16[32,128], index: 0, kind: input, shape index: {}]   ;;  %s288_s1 = inlined_call_operand.vmem [shape: bf16[128,128], index: 1, kind: input, shape index: {}]   ;;  %s289_s2 = inlined_call_operand.vmem [shape: f32[1,128], index: 2, kind: input, shape index: {}]   ;;  %s290_s3 = inlined_call_operand.hbm [shape: f32[32,128], index: 3, kind: output, shape index: {}]  }
   0x1   :  { %v189_v0 = vld [vmem:[%s288_s1 + $0x38] sm:$0xff]  ;;  %v188_v1 = vld [vmem:[%s288_s1 + $0x30] sm:$0xff] }
   0x2   :  { %99 = vmatpush.bf16.msra.mxu0 %v189_v0  ;;  %190 = vmatpush.bf16.msra.mxu1 %v189_v0 }
   0x3   :  { %8 = vsyncpa [#allocation3], 0  ;;  %v187_v2 = vld [vmem:[%s288_s1 + $0x28] sm:$0xff]  ;;  %v186_v3 = vld [vmem:[%s288_s1 + $0x20] sm:$0xff]  ;;  %s230_s10 = smov 8  }
   0x4   :  { %v185_v4 = vld [vmem:[%s288_s1 + $0x18] sm:$0xff]  ;;  %v184_v5 = vld [vmem:[%s288_s1 + $0x10] sm:$0xff]  ;;  %v183_v6 = vld [vmem:[%s288_s1 + $0x8] sm:$0xff] }
   0x5   :  { %v182_v7 = vld [vmem:[%s288_s1] sm:$0xff]  ;;  %v181_v9 = vld [vmem:[%s287_s0 + $0x8] sm:$0xff]  ;;  %s228_s1 = smov [#allocation2]  }
   0x6   :  { %100 = vmatpush.bf16.msra.mxu0 %v188_v1  ;;  %191 = vmatpush.bf16.msra.mxu1 %v188_v1  ;;  %v180_v8 = vld [vmem:[%s287_s0] sm:$0xff]  ;;  %s126_s7 = sshll.u32 %s228_s1, 4  ;;  %s128_s0 = sshll.u32 %s290_s3, 4  ;;  %s127_s7 = int_to_ptr.vmem [resolvable:$true] %s126_s7  ;;  %s129_s0 = int_to_ptr.hbm [resolvable:$true] %s128_s0 }
   0x7   :  { %v201_v10 = vld [vmem:[%s289_s2] ss:$0 sm:$0xff]  ;;  %s229_s2 = smov 128  }
   0xa   :  { %101 = vmatpush.bf16.msra.mxu0 %v187_v2  ;;  %192 = vmatpush.bf16.msra.mxu1 %v187_v2 }
   0xe   :  { %102 = vmatpush.bf16.msra.mxu0 %v186_v3  ;;  %193 = vmatpush.bf16.msra.mxu1 %v186_v3 }
  0x12   :  { %103 = vmatpush.bf16.msra.mxu0 %v185_v4  ;;  %194 = vmatpush.bf16.msra.mxu1 %v185_v4 }
  0x16   :  { %104 = vmatpush.bf16.msra.mxu0 %v184_v5  ;;  %195 = vmatpush.bf16.msra.mxu1 %v184_v5 }
  0x1a   :  { %105 = vmatpush.bf16.msra.mxu0 %v183_v6  ;;  %196 = vmatpush.bf16.msra.mxu1 %v183_v6 }
  0x1e   :  { %106 = vmatpush.bf16.msra.mxu0 %v182_v7  ;;  %197 = vmatpush.bf16.msra.mxu1 %v182_v7 }
  0x21   :  { %107 = vmatmul.bf16.vlgmr.msra.gmra.mxu0 %v180_v8  ;;  %112 = vmatmul.bf16.vlgmr.msra.gmra.mxu1 %v181_v9 }
  0x9e   :  { %v108_v11 = vpop.f32.mrf.mxu0  ;;  %v113_v12 = vpop.f32.mrf.mxu1 }
  0x9f   :  { %v109_v13 = vadd.f32 %v201_v10, %v108_v11  ;;  %v114_v14 = vadd.f32 %v201_v10, %v113_v12 }
  0xa1   :  { %118 = vst [vmem:[#allocation2] sm:$0xff] %v109_v13 }
  0xa2   :  { %120 = vst [vmem:[#allocation2 + $0x10] sm:$0xff] %v114_v14 }
  0xa6   :  { %v110_v15 = vpop.f32.mrf.mxu0  ;;  %v115_v16 = vpop.f32.mrf.mxu1 }
  0xa7   :  { %v111_v17 = vadd.f32 %v201_v10, %v110_v15  ;;  %v116_v18 = vadd.f32 %v201_v10, %v115_v16 }
  0xa9   :  { %119 = vst [vmem:[#allocation2 + $0x8] sm:$0xff] %v111_v17 }
  0xaa   :  { %121 = vst [vmem:[#allocation2 + $0x18] sm:$0xff] %v116_v18 }
  0xab   :  { %134 = dma.vmem_to_hbm [thread:$0]  %s127_s7, 512, %s129_s0, [#allocation3], %s229_s2, %s229_s2, %s230_s10  }
  0xac   :  { %226 = dma.done.wait [#allocation3], 512  }
  0xad   :  { %227 = vsyncadd [#allocation3], 4294966784 }
  0xae   :  { %139 = vsyncpa [#allocation3], 1 }

// kernel: multi_head_attention.3
= control target key start
LH: loop header
LB: loop body
LE: loop exit
PB: predicated region body
PF: predicated region fallthrough
CT: control target
= control target key end

     0   :  { %s577_s1 = inlined_call_operand.vmem [shape: bf16[128,384], index: 1, kind: input, shape index: {}]   ;;  %s578_s0 = inlined_call_operand.vmem [shape: f32[32,128], index: 0, kind: input, shape index: {}]   ;;  %s579_s2 = inlined_call_operand.vmem [shape: bf16[32,384], index: 2, kind: output, shape index: {}]  }
   0x1   :  { %v340_v0 = vld [vmem:[%s577_s1 + $0xa8] sm:$0xf]  ;;  %v372_v1 = vld [vmem:[%s577_s1 + $0xb0] sm:$0xf0]  ;;  %v371_v2 = vld [vmem:[%s577_s1 + $0xac] sm:$0xf] }
   0x2   :  { %v341_v3 = vor.u32 %v372_v1, %v340_v0  ;;  %v342_v4 = vld [vmem:[%s577_s1 + $0xb4] sm:$0xf0]  ;;  %v348_v5 = vld [vmem:[%s577_s1 + $0xb0] sm:$0xf]  ;;  %v373_v6 = vld [vmem:[%s577_s1 + $0xb8] sm:$0xf0] }
   0x3   :  { %v345_v7 = vor.u32 %v371_v2, %v342_v4  ;;  %v349_v8 = vor.u32 %v373_v6, %v348_v5  ;;  %v328_v9 = vld [vmem:[%s577_s1 + $0x90] sm:$0xf]  ;;  %v369_v10 = vld [vmem:[%s577_s1 + $0x98] sm:$0xf0]  ;;  %v368_v11 = vld [vmem:[%s577_s1 + $0x94] sm:$0xf] }
   0x4   :  { %177 = vmatpush.bf16.msra.mxu0 %v341_v3  ;;  %v329_v12 = vor.u32 %v369_v10, %v328_v9  ;;  %v330_v13 = vld [vmem:[%s577_s1 + $0x9c] sm:$0xf0]  ;;  %v336_v14 = vld [vmem:[%s577_s1 + $0x98] sm:$0xf]  ;;  %v370_v15 = vld [vmem:[%s577_s1 + $0xa0] sm:$0xf0]  ;;  %374 = vmatpush.bf16.msra.mxu3 %v341_v3 }
   0x5   :  { %196 = vmatpush.bf16.msra.mxu1 %v345_v7  ;;  %215 = vmatpush.bf16.msra.mxu2 %v349_v8  ;;  %v333_v16 = vor.u32 %v368_v11, %v330_v13  ;;  %v337_v17 = vor.u32 %v370_v15, %v336_v14  ;;  %v316_v18 = vld [vmem:[%s577_s1 + $0x78] sm:$0xf]  ;;  %v366_v19 = vld [vmem:[%s577_s1 + $0x80] sm:$0xf0]  ;;  %v365_v20 = vld [vmem:[%s577_s1 + $0x7c] sm:$0xf] }
   0x6   :  { %v318_v21 = vld [vmem:[%s577_s1 + $0x84] sm:$0xf0]  ;;  %v324_v22 = vld [vmem:[%s577_s1 + $0x80] sm:$0xf]  ;;  %v367_v23 = vld [vmem:[%s577_s1 + $0x88] sm:$0xf0]  ;;  %v317_v24 = vor.u32 %v366_v19, %v316_v18 }
   0x7   :  { %v321_v25 = vor.u32 %v365_v20, %v318_v21  ;;  %v325_v26 = vor.u32 %v367_v23, %v324_v22  ;;  %v304_v27 = vld [vmem:[%s577_s1 + $0x60] sm:$0xf]  ;;  %v363_v28 = vld [vmem:[%s577_s1 + $0x68] sm:$0xf0]  ;;  %v362_v29 = vld [vmem:[%s577_s1 + $0x64] sm:$0xf] }
   0x8   :  { %178 = vmatpush.bf16.msra.mxu0 %v329_v12  ;;  %375 = vmatpush.bf16.msra.mxu3 %v329_v12  ;;  %v306_v30 = vld [vmem:[%s577_s1 + $0x6c] sm:$0xf0]  ;;  %v312_v31 = vld [vmem:[%s577_s1 + $0x68] sm:$0xf]  ;;  %v364_v32 = vld [vmem:[%s577_s1 + $0x70] sm:$0xf0]  ;;  %v305_v33 = vor.u32 %v363_v28, %v304_v27 }
   0x9   :  { %197 = vmatpush.bf16.msra.mxu1 %v333_v16  ;;  %216 = vmatpush.bf16.msra.mxu2 %v337_v17  ;;  %v309_v34 = vor.u32 %v362_v29, %v306_v30  ;;  %v313_v35 = vor.u32 %v364_v32, %v312_v31  ;;  %v292_v36 = vld [vmem:[%s577_s1 + $0x48] sm:$0xf]  ;;  %v360_v37 = vld [vmem:[%s577_s1 + $0x50] sm:$0xf0]  ;;  %v359_v38 = vld [vmem:[%s577_s1 + $0x4c] sm:$0xf] }
   0xa   :  { %v294_v39 = vld [vmem:[%s577_s1 + $0x54] sm:$0xf0]  ;;  %v300_v40 = vld [vmem:[%s577_s1 + $0x50] sm:$0xf]  ;;  %v361_v41 = vld [vmem:[%s577_s1 + $0x58] sm:$0xf0]  ;;  %v293_v42 = vor.u32 %v360_v37, %v292_v36 }
   0xb   :  { %v297_v43 = vor.u32 %v359_v38, %v294_v39  ;;  %v301_v44 = vor.u32 %v361_v41, %v300_v40  ;;  %v280_v45 = vld [vmem:[%s577_s1 + $0x30] sm:$0xf]  ;;  %v357_v46 = vld [vmem:[%s577_s1 + $0x38] sm:$0xf0]  ;;  %v356_v47 = vld [vmem:[%s577_s1 + $0x34] sm:$0xf] }
   0xc   :  { %179 = vmatpush.bf16.msra.mxu0 %v317_v24  ;;  %376 = vmatpush.bf16.msra.mxu3 %v317_v24  ;;  %v282_v48 = vld [vmem:[%s577_s1 + $0x3c] sm:$0xf0]  ;;  %v288_v49 = vld [vmem:[%s577_s1 + $0x38] sm:$0xf]  ;;  %v358_v50 = vld [vmem:[%s577_s1 + $0x40] sm:$0xf0]  ;;  %v281_v51 = vor.u32 %v357_v46, %v280_v45 }
   0xd   :  { %198 = vmatpush.bf16.msra.mxu1 %v321_v25  ;;  %217 = vmatpush.bf16.msra.mxu2 %v325_v26  ;;  %v285_v52 = vor.u32 %v356_v47, %v282_v48  ;;  %v289_v53 = vor.u32 %v358_v50, %v288_v49  ;;  %v268_v54 = vld [vmem:[%s577_s1 + $0x18] sm:$0xf]  ;;  %v354_v55 = vld [vmem:[%s577_s1 + $0x20] sm:$0xf0]  ;;  %v353_v56 = vld [vmem:[%s577_s1 + $0x1c] sm:$0xf] }
   0xe   :  { %v270_v57 = vld [vmem:[%s577_s1 + $0x24] sm:$0xf0]  ;;  %v276_v58 = vld [vmem:[%s577_s1 + $0x20] sm:$0xf]  ;;  %v355_v59 = vld [vmem:[%s577_s1 + $0x28] sm:$0xf0]  ;;  %v269_v60 = vor.u32 %v354_v55, %v268_v54 }
   0xf   :  { %v273_v61 = vor.u32 %v353_v56, %v270_v57  ;;  %v277_v62 = vor.u32 %v355_v59, %v276_v58  ;;  %v256_v63 = vld [vmem:[%s577_s1] sm:$0xf]  ;;  %v351_v0 = vld [vmem:[%s577_s1 + $0x8] sm:$0xf0]  ;;  %v350_v1 = vld [vmem:[%s577_s1 + $0x4] sm:$0xf] }
  0x10   :  { %180 = vmatpush.bf16.msra.mxu0 %v305_v33  ;;  %377 = vmatpush.bf16.msra.mxu3 %v305_v33  ;;  %v258_v2 = vld [vmem:[%s577_s1 + $0xc] sm:$0xf0]  ;;  %v264_v3 = vld [vmem:[%s577_s1 + $0x8] sm:$0xf]  ;;  %v352_v4 = vld [vmem:[%s577_s1 + $0x10] sm:$0xf0]  ;;  %v257_v6 = vor.u32 %v351_v0, %v256_v63 }
  0x11   :  { %199 = vmatpush.bf16.msra.mxu1 %v309_v34  ;;  %218 = vmatpush.bf16.msra.mxu2 %v313_v35  ;;  %v11_v5 = vld [vmem:[%s578_s0] sm:$0xff]  ;;  %v12_v7 = vld [vmem:[%s578_s0 + $0x8] sm:$0xff]  ;;  %v13_v8 = vld [vmem:[%s578_s0 + $0x10] sm:$0xff]  ;;  %v261_v10 = vor.u32 %v350_v1, %v258_v2  ;;  %v265_v11 = vor.u32 %v352_v4, %v264_v3 }
  0x12   :  { %v14_v9 = vld [vmem:[%s578_s0 + $0x18] sm:$0xff]  ;;  %v15_v12 = vpack.c.bf16 %v12_v7, %v11_v5 }
  0x13   :  { %v16_v13 = vpack.c.bf16 %v14_v9, %v13_v8 }
  0x14   :  { %181 = vmatpush.bf16.msra.mxu0 %v293_v42  ;;  %378 = vmatpush.bf16.msra.mxu3 %v293_v42 }
  0x15   :  { %200 = vmatpush.bf16.msra.mxu1 %v297_v43  ;;  %219 = vmatpush.bf16.msra.mxu2 %v301_v44 }
  0x18   :  { %182 = vmatpush.bf16.msra.mxu0 %v281_v51  ;;  %379 = vmatpush.bf16.msra.mxu3 %v281_v51 }
  0x19   :  { %201 = vmatpush.bf16.msra.mxu1 %v285_v52  ;;  %220 = vmatpush.bf16.msra.mxu2 %v289_v53 }
  0x1c   :  { %183 = vmatpush.bf16.msra.mxu0 %v269_v60  ;;  %380 = vmatpush.bf16.msra.mxu3 %v269_v60 }
  0x1d   :  { %202 = vmatpush.bf16.msra.mxu1 %v273_v61  ;;  %221 = vmatpush.bf16.msra.mxu2 %v277_v62 }
  0x20   :  { %184 = vmatpush.bf16.msra.mxu0 %v257_v6  ;;  %381 = vmatpush.bf16.msra.mxu3 %v257_v6 }
  0x21   :  { %203 = vmatpush.bf16.msra.mxu1 %v261_v10  ;;  %222 = vmatpush.bf16.msra.mxu2 %v265_v11 }
  0x23   :  { %185 = vmatmul.bf16.vlgmr.msra.gmra.mxu0 %v15_v12  ;;  %190 = vmatmul.bf16.vlgmr.msra.gmra.mxu3 %v16_v13 }
  0x24   :  { %204 = vmatmul.bf16.vlgmr.msra.gmra.mxu1 %v15_v12  ;;  %223 = vmatmul.bf16.vlgmr.msra.gmra.mxu2 %v15_v12 }
  0x34   :  { %209 = vmatmul.bf16.gmra.mxu1 %v16_v13  ;;  %228 = vmatmul.bf16.gmra.mxu2 %v16_v13 }
  0xa0   :  { %v186_v14 = vpop.f32.mrf.mxu0 }
  0xa1   :  { %v205_v15 = vpop.f32.mrf.mxu1 }
  0xa2   :  { %v234_v16 = vpack.c.bf16 %v205_v15, %v186_v14 }
  0xa4   :  { %242 = vst [vmem:[%s579_s2] sm:$0xff] %v234_v16 }
  0xa6   :  { %v191_v22 = vpop.f32.mrf.mxu3 }
  0xa7   :  { %v224_v17 = vpop.f32.mrf.mxu2 }
  0xa8   :  { %v235_v18 = vpack.c.bf16 %v224_v17, %v224_v17  ;;  %v188_v19 = vpop.f32.mrf.mxu0 }
  0xa9   :  { %v207_v20 = vpop.f32.mrf.mxu1 }
  0xaa   :  { %243 = vst [vmem:[%s579_s2 + $0x8] sm:$0xf] %v235_v18  ;;  %v236_v21 = vpack.c.bf16 %v207_v20, %v188_v19 }
  0xac   :  { %244 = vst [vmem:[%s579_s2 + $0xc] sm:$0xff] %v236_v21 }
  0xae   :  { %v193_v29 = vpop.f32.mrf.mxu3 }
  0xaf   :  { %v226_v23 = vpop.f32.mrf.mxu2 }
  0xb0   :  { %v237_v24 = vpack.c.bf16 %v226_v23, %v226_v23 }
  0xb1   :  { %v210_v25 = vpop.f32.mrf.mxu1 }
  0xb2   :  { %245 = vst [vmem:[%s579_s2 + $0x14] sm:$0xf] %v237_v24  ;;  %v238_v26 = vpack.c.bf16 %v210_v25, %v191_v22 }
  0xb4   :  { %246 = vst [vmem:[%s579_s2 + $0x18] sm:$0xff] %v238_v26 }
  0xb7   :  { %v229_v27 = vpop.f32.mrf.mxu2 }
  0xb8   :  { %v239_v28 = vpack.c.bf16 %v229_v27, %v229_v27 }
  0xb9   :  { %v212_v30 = vpop.f32.mrf.mxu1 }
  0xba   :  { %247 = vst [vmem:[%s579_s2 + $0x20] sm:$0xf] %v239_v28  ;;  %v240_v31 = vpack.c.bf16 %v212_v30, %v193_v29 }
  0xbc   :  { %248 = vst [vmem:[%s579_s2 + $0x24] sm:$0xff] %v240_v31 }
  0xbf   :  { %v231_v32 = vpop.f32.mrf.mxu2 }
  0xc0   :  { %v241_v33 = vpack.c.bf16 %v231_v32, %v231_v32 }
  0xc2   :  { %249 = vst [vmem:[%s579_s2 + $0x2c] sm:$0xf] %v241_v33 }

// kernel: multi_head_attention.4
= control target key start
LH: loop header
LB: loop body
LE: loop exit
PB: predicated region body
PF: predicated region fallthrough
CT: control target
= control target key end

     0   :  { %s1246_s12 = smov 0   ;;  %s1248_s13 = smov 0   ;;  %s1406_s0 = inlined_call_operand.vmem [shape: bf16[2,16,384], index: 0, kind: input, shape index: {}, may-alias: {0,1,2}]   ;;  %s1407_s1 = inlined_call_operand.vmem [shape: bf16[2,16,384], index: 1, kind: input, shape index: {}, may-alias: {0,1,2}]   ;;  %s1408_s2 = inlined_call_operand.vmem [shape: bf16[2,16,384], index: 2, kind: input, shape index: {}, may-alias: {0,1,2}]   ;;  %s1409_s3 = inlined_call_operand.vmem [shape: bf16[2,16,128], index: 3, kind: output, shape index: {}]  }
   0x1   :  { %s1250_s14 = smov 0   ;;  %s1252_s15 = smov 0  }
   0x2   :  { %s1254_s16 = smov 0  }
   0x3 LB: > { %s25_s17 = sadd.s32 1, %s1217_s15  ;;  %p41_p1 = scmp.ne.s32.totalorder %s1209_s13, %s1205_s12  ;;  %s1221_s16 = sphi %s1254_s16, %s13_s16   ;;  %s1217_s15 = sphi %s1252_s15, %s1414_s15   ;;  %s1213_s14 = sphi %s1250_s14, %s1413_s14   ;;  %s1209_s13 = sphi %s1248_s13, %s1412_s13   ;;  %s1205_s12 = sphi %s1246_s12, %s1411_s12  }
   0x4   : > { %p27_p0 = scmp.ge.s32.totalorder %s25_s17, 2  ;;  %p42_p2 = scmp.eq.s32.totalorder %s1221_s16, 0 }
   0x5   : > { %s34_s20 = sadd.s32 1, %s1209_s13  ;;  %p1019_p5 = scmp.ge.s32.totalorder %s1221_s16, 2 }
   0x6   : > { %s1416_s17 = smov (%p27_p0, %s25_s17), 0  ;;  %p1277_p3 = por %p42_p2, %p41_p1 }
   0x7   : > { %s29_s19 = ssub.s32 %s1217_s15, %s1416_s17  ;;  %155 = sbr.rel (%p1019_p5) target bundleno = 33 (0x21), region = 16 }
   0x8   : > { %p32_p4 = scmp.eq.s32.totalorder %s29_s19, 0 }
   0xa   : > { %s1285_s21 = scalar_select %p32_p4, %s1209_s13, %s34_s20  }
   0xc   : > { %158 = sbr.rel (!%p1277_p3) target bundleno = 19 (0x13), region = 20  ;;  %s160_s22 = sand.u32 (%p1277_p3), 1, %s1209_s13  }
   0xd   : > { %s1107_s23 = smul.u32 (%p1277_p3), 24, %s1217_s15  ;;  %s1020_s24 = sshll.u32 (%p1277_p3), %s160_s22, 3 }
   0xe   : > { %s162_s28 = scalar_lea.vmem (%p1277_p3), [#allocation2], %s1020_s24 }
   0xf   : > { %s166_s27 = scalar_lea.vmem (%p1277_p3), %s1406_s0, %s1107_s23 }
  0x10   : > { %v183_v0 = vld [vmem:[%s166_s27] sm:$0xf] (%p1277_p3)  ;;  %v185_v1 = vld [vmem:[%s166_s27 + $0xc] sm:$0xf] (%p1277_p3) }
  0x11   : > { %184 = vst [vmem:[%s162_s28] sm:$0xf] %v183_v0 }
  0x12   : > { %186 = vst [vmem:[%s162_s28 + $0x4] sm:$0xf] %v185_v1 }
  0x13 PF: > { %214 = sbr.rel (!%p1277_p3) target bundleno = 26 (0x1a), region = 61  ;;  %s216_s29 = sand.u32 (%p1277_p3), 1, %s1209_s13  }
  0x14   : > { %s1023_s30 = smul.u32 (%p1277_p3), 24, %s1217_s15  ;;  %s1022_s4 = sshll.u32 (%p1277_p3), %s216_s29, 3 }
  0x15   : > { %s218_s8 = scalar_lea.vmem (%p1277_p3), [#allocation3], %s1022_s4 }
  0x16   : > { %s927_s7 = scalar_lea.vmem (%p1277_p3), %s1407_s1, %s1023_s30 }
  0x17   : > { %v1024_v2 = vld [vmem:[%s927_s7 + $0x4] sm:$0xf] (%p1277_p3)  ;;  %v1025_v3 = vld [vmem:[%s927_s7 + $0x10] sm:$0xf] (%p1277_p3) }
  0x18   : > { %241 = vst [vmem:[%s218_s8] sm:$0xf] %v1024_v2 }
  0x19   : > { %243 = vst [vmem:[%s218_s8 + $0x4] sm:$0xf] %v1025_v3 }
  0x1a PF: > { %271 = sbr.rel (!%p1277_p3) target bundleno = 33 (0x21), region = 102  ;;  %s273_s9 = sand.u32 (%p1277_p3), 1, %s1209_s13  }
  0x1b   : > { %s1027_s10 = smul.u32 (%p1277_p3), 24, %s1217_s15  ;;  %s1026_s11 = sshll.u32 (%p1277_p3), %s273_s9, 3 }
  0x1c   : > { %s275_s23 = scalar_lea.vmem (%p1277_p3), [#allocation4], %s1026_s11 }
  0x1d   : > { %s934_s22 = scalar_lea.vmem (%p1277_p3), %s1408_s2, %s1027_s10 }
  0x1e   : > { %v1028_v4 = vld [vmem:[%s934_s22 + $0x8] sm:$0xf] (%p1277_p3)  ;;  %v1029_v5 = vld [vmem:[%s934_s22 + $0x14] sm:$0xf] (%p1277_p3) }
  0x1f   : > { %298 = vst [vmem:[%s275_s23] sm:$0xf] %v1028_v4 }
  0x20   : > { %300 = vst [vmem:[%s275_s23 + $0x4] sm:$0xf] %v1029_v5 }
  0x21 PF: > { %p1030_p6 = scmp.ge.s32.totalorder %s1221_s16, 1  ;;  %p327_p7 = scmp.lt.s32.totalorder %s1221_s16, 3 }
  0x23   : > { %p328_p8 = pnand %p1030_p6, %p327_p7 }
  0x24   : > { %s334_s18 = sand.u32 (!%p328_p8), 1, %s1205_s12   ;;  %s1223_s26 = smov (!%p328_p8), 96  }
  0x25   : > { %331 = sbr.rel (%p328_p8) target bundleno = 863 (0x35f), region = 143  ;;  %s1312_s24 = sshll.u32 (!%p328_p8), %s334_s18, 3 }
  0x26   : > { %s343_s25 = scalar_lea.vmem (!%p328_p8), [#allocation3], %s1312_s24  ;;  %s1224_s27 = smov (!%p328_p8), 64  }
  0x27   : > { %s336_s28 = scalar_lea.vmem (!%p328_p8), [#allocation2], %s1312_s24  ;;  %s1225_s12 = smov (!%p328_p8), 32  }
  0x28   : > { %s1331_s29 = scalar_lea.vmem (!%p328_p8), [#allocation4], %s1312_s24  ;;  %p384_p9 = scmp.lt.s32.totalorder (!%p328_p8), %s1213_s14, 1 }
  0x2a   : > { %vm409_vm0 = vcmask 261120   ;;  %v1096_v6 = vld [vmem:[%s343_s25] sm:$0xff]  ;;  %v1095_v10 = vld [vmem:[%s336_s28] sm:$0xff]  ;;  %vm430_vm1 = vcmask 130048   ;;  %s1418_s14 = smov (!%p384_p9, %s1213_s14), 1 }
  0x2b   : > { %v1099_v7 = vld [vmem:[%s343_s25] sm:$0xff]  ;;  %v414_v9 = vsel %vm409_vm0, %v1096_v6, 0  ;;  %v1098_v11 = vld [vmem:[%s336_s28] sm:$0xff]  ;;  %s1094_s30 = sshll.u32 %s1418_s14, 3 }
  0x2c   : > { %v1102_v8 = vld [vmem:[%s343_s25] sm:$0xff]  ;;  %526 = vrot.lane.b32.xlu1 %v1099_v7, %s1223_s26  ;;  %423 = vmatpush.bf16.xpose.msra.mxu0 %v414_v9  ;;  %v1104_v13 = vld [vmem:[%s336_s28] sm:$0xff]  ;;  %s1375_s6 = scalar_lea.vmem %s1409_s3, %s1094_s30 }
  0x2d   : > { %653 = vrot.lane.b32.xlu2 %v1102_v8, %s1224_s27  ;;  %v1105_v12 = vld [vmem:[%s343_s25] sm:$0xff]  ;;  %v1101_v25 = vld [vmem:[%s336_s28] sm:$0xff] }
  0x2e   : > { %v1097_v26 = vld [vmem:[%s1331_s29] sm:$0xff] }
  0x2f   : > { %466 = vmatpush.bf16.msra.mxu1 %v1097_v26  ;;  %v1100_v29 = vld [vmem:[%s1331_s29] sm:$0xff] }
  0x30   : > { %v1106_v47 = vld [vmem:[%s1331_s29] sm:$0xff] }
  0x33   : > { %1044 = vmatmul.msk.bf16.vlgmr.msra.gmra.mxu0 %vm409_vm0, %v1095_v10 }
  0x34   : > { %519 = vrot.lane.b32.xlu1 %v1098_v11, %s1223_s26 }
  0x35   : > { %780 = vrot.lane.b32.xlu2 %v1105_v12, %s1225_s12 }
  0x3c   : > { %773 = vrot.lane.b32.xlu1 %v1104_v13, %s1225_s12  ;;  %v1103_v13 = vld [vmem:[%s1331_s29] sm:$0xff] }
  0x87   : > { %v654_v14 = vpop.permute.xlu2 %653 }
  0x88   : > { %v659_v27 = vsel %vm409_vm0, %v654_v14, 0 }
  0x89   : > { %668 = vmatpush.bf16.xpose.msrb.mxu1 %v659_v27 }
  0x8f   : > { %v781_v15 = vpop.permute.xlu2 %780 }
  0x90   : > { %v786_v16 = vsel %vm409_vm0, %v781_v15, 0 }
  0x91   : > { %795 = vmatpush.bf16.xpose.msrb.mxu0 %v786_v16 }
  0x9e   : > { %v527_v17 = vpop.permute.xlu1 %526 }
  0x9f   : > { %v532_v18 = vsel %vm409_vm0, %v527_v17, 0 }
  0xa0   : > { %541 = vmatpush.bf16.xpose.msra.mxu2 %v532_v18 }
  0xa6   : > { %v520_v19 = vpop.permute.xlu1 %519 }
  0xa7   : > { %1058 = vmatmul.msk.bf16.vlgmr.msra.gmra.mxu2 %vm409_vm0, %v520_v19 }
  0xae   : > { %v774_v20 = vpop.permute.xlu1 %773 }
  0xaf   : > { %1086 = vmatmul.msk.bf16.vlgmr.msrb.gmra.mxu0 %vm409_vm0, %v774_v20 }
  0xb0   : > { %v425_v21 = vpop.f32.mrf.mxu0 }
  0xb1   : > { %v431_v22 = vsel %vm430_vm1, %v425_v21, -inf }
  0xb2   : > { %432 = vmax.xlane.f32.xlu0 %v431_v22 }
  0xb8   : > { %v427_v23 = vpop.f32.mrf.mxu0 }
  0xb9   : > { %v434_v24 = vsel %vm430_vm1, %v427_v23, -inf }
  0xba   : > { %435 = vmax.xlane.f32.xlu0 %v434_v24 }
  0xce   : > { %646 = vrot.lane.b32.xlu0 %v1101_v25, %s1224_s27 }
  0xd6   : > { %572 = vrot.lane.b32.xlu0 %v1100_v29, %s1223_s26 }
 0x125   : > { %v433_v28 = vpop.xlane.xlu0 %432 }
 0x126   : > { %v437_v30 = vsub.f32 %v425_v21, %v433_v28 }
 0x128   : > { %v439_v34 = vmul.f32 1.442695, %v437_v30 }
 0x12a   : > { %v543_v31 = vpop.f32.mrf.mxu2  ;;  %1151 = vpow2.f32 %v439_v34 }
 0x12b   : > { %v548_v32 = vsel %vm430_vm1, %v543_v31, -inf }
 0x12c   : > { %v797_v33 = vpop.f32.mrf.mxu0  ;;  %549 = vmax.xlane.f32.xlu2 %v548_v32 }
 0x12d   : > { %v436_v35 = vpop.xlane.xlu0 %435  ;;  %v802_v38 = vsel %vm430_vm1, %v797_v33, -inf }
 0x12e   : > { %v438_v36 = vsub.f32 %v427_v23, %v436_v35 }
 0x130   : > { %v441_v37 = vmul.f32 1.442695, %v438_v36  ;;  %v1152_v42 = vpop.eup %1151 }
 0x131   : > { %v443_v15 = vsel %vm430_vm1, %v1152_v42, 0.0 }
 0x132   : > { %v545_v39 = vpop.f32.mrf.mxu2  ;;  %1153 = vpow2.f32 %v441_v37 }
 0x133   : > { %v551_v40 = vsel %vm430_vm1, %v545_v39, -inf }
 0x134   : > { %552 = vmax.xlane.f32.xlu1 %v551_v40  ;;  %803 = vmax.xlane.f32.xlu2 %v802_v38  ;;  %v799_v41 = vpop.f32.mrf.mxu0 }
 0x135   : > { %v805_v44 = vsel %vm430_vm1, %v799_v41, -inf }
 0x138   : > { %v1154_v43 = vpop.eup %1153 }
 0x139   : > { %v449_v45 = vpack.c.bf16 %v1154_v43, %v1152_v42  ;;  %v446_v16 = vsel %vm430_vm1, %v1154_v43, 0.0 }
 0x13b   : > { %1049 = vmatmul.msk.bf16.vlgmr.msra.gmra.mxu1 %vm430_vm1, %v449_v45 }
 0x13c   : > { %806 = vmax.xlane.f32.xlu1 %v805_v44 }
 0x140   : > { %v647_v46 = vpop.permute.xlu0 %646 }
 0x148   : > { %v573_v48 = vpop.permute.xlu0 %572 }
 0x149   : > { %585 = vmatpush.bf16.msra.mxu3 %v573_v48 }
 0x14b   : > { %1072 = vmatmul.msk.bf16.vlgmr.msrb.gmra.mxu1 %vm409_vm0, %v647_v46 }
 0x155   : > { %826 = vrot.lane.b32.xlu1 %v1106_v47, %s1225_s12 }
 0x19f   : > { %v550_v49 = vpop.xlane.xlu2 %549 }
 0x1a0   : > { %v554_v50 = vsub.f32 %v543_v31, %v550_v49 }
 0x1a2   : > { %v556_v51 = vmul.f32 1.442695, %v554_v50 }
 0x1a4   : > { %1155 = vpow2.f32 %v556_v51 }
 0x1a7   : > { %v553_v52 = vpop.xlane.xlu1 %552  ;;  %v804_v57 = vpop.xlane.xlu2 %803 }
 0x1a8   : > { %v555_v53 = vsub.f32 %v545_v39, %v553_v52  ;;  %v808_v60 = vsub.f32 %v797_v33, %v804_v57 }
 0x1aa   : > { %v558_v54 = vmul.f32 1.442695, %v555_v53  ;;  %v1156_v55 = vpop.eup %1155  ;;  %v810_v63 = vmul.f32 1.442695, %v808_v60 }
 0x1ab   : > { %v560_v9 = vsel %vm430_vm1, %v1156_v55, 0.0 }
 0x1ac   : > { %1157 = vpow2.f32 %v558_v54 }
 0x1ad   : > { %1159 = vpow2.f32 %v810_v63 }
 0x1af   : > { %v807_v58 = vpop.xlane.xlu1 %806 }
 0x1b0   : > { %v809_v61 = vsub.f32 %v799_v41, %v807_v58 }
 0x1b2   : > { %v1158_v56 = vpop.eup %1157  ;;  %v812_v0 = vmul.f32 1.442695, %v809_v61 }
 0x1b3   : > { %v566_v59 = vpack.c.bf16 %v1158_v56, %v1156_v55  ;;  %v1160_v2 = vpop.eup %1159  ;;  %v563_v11 = vsel %vm430_vm1, %v1158_v56, 0.0 }
 0x1b4   : > { %1161 = vpow2.f32 %v812_v0  ;;  %v814_v12 = vsel %vm430_vm1, %v1160_v2, 0.0 }
 0x1b5   : > { %1063 = vmatmul.msk.bf16.vlgmr.msra.gmra.mxu3 %vm430_vm1, %v566_v59 }
 0x1b8   : > { %v1346_v62 = vpop.f32.mrf.mxu1 }
 0x1ba   : > { %v1162_v3 = vpop.eup %1161 }
 0x1bb   : > { %v820_v5 = vpack.c.bf16 %v1162_v3, %v1160_v2  ;;  %v817_v14 = vsel %vm430_vm1, %v1162_v3, 0.0 }
 0x1c0   : > { %v1348_v1 = vpop.f32.mrf.mxu1 }
 0x1c7   : > { %v827_v4 = vpop.permute.xlu1 %826 }
 0x1c8   : > { %839 = vmatpush.bf16.msrb.mxu2 %v827_v4  ;;  %v670_v6 = vpop.f32.mrf.mxu1 }
 0x1c9   : > { %v675_v7 = vsel %vm430_vm1, %v670_v6, -inf }
 0x1ca   : > { %676 = vmax.xlane.f32.xlu0 %v675_v7 }
 0x1cb   : > { %1091 = vmatmul.msk.bf16.vlgmr.msrb.gmra.mxu2 %vm430_vm1, %v820_v5 }
 0x1d0   : > { %v672_v8 = vpop.f32.mrf.mxu1 }
 0x1d1   : > { %v678_v10 = vsel %vm430_vm1, %v672_v8, -inf }
 0x1d2   : > { %561 = vadd.xlane.f32.xlu0 %v560_v9  ;;  %679 = vmax.xlane.f32.xlu2 %v678_v10 }
 0x1da   : > { %564 = vadd.xlane.f32.xlu0 %v563_v11 }
 0x1e2   : > { %815 = vadd.xlane.f32.xlu0 %v814_v12 }
 0x1ea   : > { %818 = vadd.xlane.f32.xlu0 %v817_v14  ;;  %699 = vrot.lane.b32.xlu2 %v1103_v13, %s1224_s27 }
 0x1f2   : > { %444 = vadd.xlane.f32.xlu0 %v443_v15 }
 0x1fa   : > { %447 = vadd.xlane.f32.xlu0 %v446_v16 }
 0x238   : > { %v587_v39 = vpop.f32.mrf.mxu3 }
 0x23d   : > { %v677_v17 = vpop.xlane.xlu0 %676 }
 0x23e   : > { %v681_v18 = vsub.f32 %v670_v6, %v677_v17 }
 0x240   : > { %v683_v19 = vmul.f32 1.442695, %v681_v18  ;;  %v589_v57 = vpop.f32.mrf.mxu3 }
 0x242   : > { %1163 = vpow2.f32 %v683_v19 }
 0x245   : > { %v680_v20 = vpop.xlane.xlu2 %679  ;;  %v562_v21 = vpop.xlane.xlu0 %561 }
 0x246   : > { %v682_v22 = vsub.f32 %v672_v8, %v680_v20  ;;  %1165 = vrcp.f32 %v562_v21  ;;  %v601_v32 = vand.u32 2147483647, %v562_v21  ;;  %v603_v33 = vand.u32 2147483648, %v562_v21 }
 0x247   : > { %vm597_vm3 = vweird.f32 %v562_v21 }
 0x248   : > { %v1164_v23 = vpop.eup %1163  ;;  %v685_v24 = vmul.f32 1.442695, %v682_v22  ;;  %v604_v40 = vor.u32 1.1754944e-38, %v603_v33  ;;  %vm602_vm5 = vcmp.eq.f32.partialorder %v601_v32, 8.507059e+37 }
 0x249   : > { %v687_v25 = vsel %vm430_vm1, %v1164_v23, 0.0 }
 0x24a   : > { %1167 = vpow2.f32 %v685_v24  ;;  %688 = vadd.xlane.f32.xlu2 %v687_v25 }
 0x24c   : > { %v1166_v26 = vpop.eup %1165 }
 0x24d   : > { %v593_v27 = vmul.f32 %v1166_v26, %v562_v21  ;;  %v700_v28 = vpop.permute.xlu2 %699  ;;  %v565_v29 = vpop.xlane.xlu0 %564  ;;  %vm598_vm2 = vweird.f32 %v1166_v26 }
 0x24e   : > { %1169 = vrcp.f32 %v565_v29  ;;  %712 = vmatpush.bf16.msrb.mxu3 %v700_v28  ;;  %vm599_vm4 = vmor %vm597_vm3, %vm598_vm2  ;;  %v618_v47 = vand.u32 2147483648, %v565_v29  ;;  %v616_v50 = vand.u32 2147483647, %v565_v29  ;;  %vm612_vm7 = vweird.f32 %v565_v29  ;;  %v841_v5 = vpop.f32.mrf.mxu2 }
 0x24f   : > { %v594_v30 = vsub.f32 1.0, %v593_v27 }
 0x250   : > { %v1168_v31 = vpop.eup %1167  ;;  %v619_v53 = vor.u32 1.1754944e-38, %v618_v47  ;;  %vm617_vm9 = vcmp.eq.f32.partialorder %v616_v50, 8.507059e+37 }
 0x251   : > { %v595_v34 = vmul.f32 %v1166_v26, %v594_v30  ;;  %v690_v35 = vsel %vm430_vm1, %v1168_v31, 0.0  ;;  %v693_v36 = vpack.c.bf16 %v1168_v31, %v1164_v23 }
 0x252   : > { %691 = vadd.xlane.f32.xlu1 %v690_v35 }
 0x253   : > { %v596_v37 = vadd.f32 %v1166_v26, %v595_v34  ;;  %1077 = vmatmul.msk.bf16.vlgmr.msrb.gmra.mxu3 %vm430_vm1, %v693_v36 }
 0x254   : > { %v1170_v38 = vpop.eup %1169 }
 0x255   : > { %v600_v41 = vsel %vm599_vm4, %v1166_v26, %v596_v37  ;;  %v608_v42 = vmul.f32 %v1170_v38, %v565_v29  ;;  %v816_v43 = vpop.xlane.xlu0 %815  ;;  %vm613_vm6 = vweird.f32 %v1170_v38 }
 0x256   : > { %v605_v44 = vsel %vm602_vm5, %v604_v40, %v600_v41  ;;  %1171 = vrcp.f32 %v816_v43  ;;  %vm614_vm8 = vmor %vm612_vm7, %vm613_vm6  ;;  %v857_v0 = vand.u32 2147483648, %v816_v43  ;;  %v855_v2 = vand.u32 2147483647, %v816_v43  ;;  %v843_v22 = vpop.f32.mrf.mxu2 }
 0x257   : > { %v606_v45 = vmul.f32 %v605_v44, %v587_v39  ;;  %v609_v46 = vsub.f32 1.0, %v608_v42  ;;  %vm851_vm11 = vweird.f32 %v816_v43  ;;  %vm505_vm6 = vcmask 257024  }
 0x258   : > { %v858_v6 = vor.u32 1.1754944e-38, %v857_v0  ;;  %vm856_vm13 = vcmp.eq.f32.partialorder %v855_v2, 8.507059e+37 }
 0x259   : > { %v622_v48 = vpack.c.bf16 %v606_v45, %v606_v45  ;;  %v610_v49 = vmul.f32 %v1170_v38, %v609_v46 }
 0x25b   : > { %v611_v51 = vadd.f32 %v1170_v38, %v610_v49  ;;  %626 = vrot.lane.b32.xlu0 %v622_v48, %s1225_s12 }
 0x25c   : > { %v1172_v52 = vpop.eup %1171 }
 0x25d   : > { %v615_v54 = vsel %vm614_vm8, %v1170_v38, %v611_v51  ;;  %v847_v55 = vmul.f32 %v1172_v52, %v816_v43  ;;  %v819_v56 = vpop.xlane.xlu0 %818  ;;  %vm852_vm10 = vweird.f32 %v1172_v52 }
 0x25e   : > { %v620_v58 = vsel %vm617_vm9, %v619_v53, %v615_v54  ;;  %1173 = vrcp.f32 %v819_v56  ;;  %vm853_vm12 = vmor %vm851_vm11, %vm852_vm10  ;;  %v872_v14 = vand.u32 2147483648, %v819_v56  ;;  %v870_v15 = vand.u32 2147483647, %v819_v56 }
 0x25f   : > { %v621_v59 = vmul.f32 %v620_v58, %v589_v57  ;;  %v848_v60 = vsub.f32 1.0, %v847_v55  ;;  %vm866_vm15 = vweird.f32 %v819_v56  ;;  %vm632_vm11 = vcmask 519424  }
 0x260   : > { %v873_v18 = vor.u32 1.1754944e-38, %v872_v14  ;;  %vm871_vm1 = vcmp.eq.f32.partialorder %v870_v15, 8.507059e+37 }
 0x261   : > { %v623_v61 = vpack.c.bf16 %v621_v59, %v621_v59  ;;  %v849_v63 = vmul.f32 %v1172_v52, %v848_v60 }
 0x263   : > { %628 = vrot.lane.b32.xlu2 %v623_v61, %s1225_s12  ;;  %v850_v3 = vadd.f32 %v1172_v52, %v849_v63 }
 0x264   : > { %v1174_v4 = vpop.eup %1173 }
 0x265   : > { %v862_v7 = vmul.f32 %v1174_v4, %v819_v56  ;;  %v445_v8 = vpop.xlane.xlu0 %444  ;;  %v854_v9 = vsel %vm853_vm12, %v1172_v52, %v850_v3  ;;  %vm867_vm14 = vweird.f32 %v1174_v4 }
 0x266   : > { %1175 = vrcp.f32 %v445_v8  ;;  %v859_v11 = vsel %vm856_vm13, %v858_v6, %v854_v9  ;;  %vm868_vm0 = vmor %vm866_vm15, %vm867_vm14  ;;  %v484_v25 = vand.u32 2147483648, %v445_v8  ;;  %v482_v28 = vand.u32 2147483647, %v445_v8 }
 0x267   : > { %v863_v10 = vsub.f32 1.0, %v862_v7  ;;  %v1366_v12 = vmul.f32 %v859_v11, %v841_v5  ;;  %vm478_vm3 = vweird.f32 %v445_v8 }
 0x268   : > { %v485_v32 = vor.u32 1.1754944e-38, %v484_v25  ;;  %vm483_vm5 = vcmp.eq.f32.partialorder %v482_v28, 8.507059e+37 }
 0x269   : > { %v864_v13 = vmul.f32 %v1174_v4, %v863_v10  ;;  %v876_v15 = vpack.c.bf16 %v1366_v12, %v1366_v12 }
 0x26b   : > { %v865_v16 = vadd.f32 %v1174_v4, %v864_v13 }
 0x26c   : > { %v1176_v17 = vpop.eup %1175 }
 0x26d   : > { %v474_v19 = vmul.f32 %v1176_v17, %v445_v8  ;;  %v448_v20 = vpop.xlane.xlu0 %447  ;;  %v869_v21 = vsel %vm868_vm0, %v1174_v4, %v865_v16  ;;  %vm479_vm2 = vweird.f32 %v1176_v17 }
 0x26e   : > { %1177 = vrcp.f32 %v448_v20  ;;  %v874_v24 = vsel %vm871_vm1, %v873_v18, %v869_v21  ;;  %vm480_vm4 = vmor %vm478_vm3, %vm479_vm2  ;;  %v499_v38 = vand.u32 2147483648, %v448_v20  ;;  %v497_v40 = vand.u32 2147483647, %v448_v20 }
 0x26f   : > { %v475_v23 = vsub.f32 1.0, %v474_v19  ;;  %v875_v26 = vmul.f32 %v874_v24, %v843_v22  ;;  %vm493_vm8 = vweird.f32 %v448_v20 }
 0x270   : > { %vm498_vm10 = vcmp.eq.f32.partialorder %v497_v40, 8.507059e+37 }
 0x271   : > { %v476_v27 = vmul.f32 %v1176_v17, %v475_v23  ;;  %v877_v29 = vpack.c.bf16 %v875_v26, %v875_v26 }
 0x273   : > { %v477_v30 = vadd.f32 %v1176_v17, %v476_v27  ;;  %882 = vrot.lane.b32.xlu2 %v877_v29, %s1223_s26 }
 0x274   : > { %v1178_v31 = vpop.eup %1177 }
 0x275   : > { %v481_v33 = vsel %vm480_vm4, %v1176_v17, %v477_v30  ;;  %v489_v34 = vmul.f32 %v1178_v31, %v448_v20  ;;  %vm494_vm7 = vweird.f32 %v1178_v31  ;;  %vm759_vm4 = vcmask 781824  }
 0x276   : > { %v486_v35 = vsel %vm483_vm5, %v485_v32, %v481_v33  ;;  %vm495_vm9 = vmor %vm493_vm8, %vm494_vm7  ;;  %vm886_vm5 = vcmask 1044224  }
 0x277   : > { %v487_v36 = vmul.f32 %v486_v35, %v1346_v62  ;;  %v490_v37 = vsub.f32 1.0, %v489_v34  ;;  %v500_v62 = vor.u32 1.1754944e-38, %v499_v38 }
 0x279   : > { %v491_v39 = vmul.f32 %v1178_v31, %v490_v37  ;;  %v503_v41 = vpack.c.bf16 %v487_v36, %v487_v36 }
 0x27b   : > { %v492_v42 = vadd.f32 %v1178_v31, %v491_v39  ;;  %506 = vst.msk [vmem:[%s1375_s6] sm:$0xf] %vm505_vm6, %v503_v41 }
 0x27d   : > { %v496_v43 = vsel %vm495_vm9, %v1178_v31, %v492_v42 }
 0x27e   : > { %v501_v44 = vsel %vm498_vm10, %v500_v62, %v496_v43 }
 0x27f   : > { %v502_v45 = vmul.f32 %v501_v44, %v1348_v1 }
 0x281   : > { %v504_v46 = vpack.c.bf16 %v502_v45, %v502_v45 }
 0x283   : > { %507 = vst.msk [vmem:[%s1375_s6 + $0x4] sm:$0xf] %vm505_vm6, %v504_v46 }
 0x2bd   : > { %v689_v47 = vpop.xlane.xlu2 %688 }
 0x2be   : > { %1179 = vrcp.f32 %v689_v47  ;;  %v730_v58 = vand.u32 2147483648, %v689_v47  ;;  %vm724_vm13 = vweird.f32 %v689_v47  ;;  %v728_v59 = vand.u32 2147483647, %v689_v47 }
 0x2c0   : > { %v731_v63 = vor.u32 1.1754944e-38, %v730_v58  ;;  %vm729_vm15 = vcmp.eq.f32.partialorder %v728_v59, 8.507059e+37 }
 0x2c4   : > { %v1180_v48 = vpop.eup %1179 }
 0x2c5   : > { %v720_v49 = vmul.f32 %v1180_v48, %v689_v47  ;;  %v692_v50 = vpop.xlane.xlu1 %691  ;;  %v629_v51 = vpop.permute.xlu2 %628  ;;  %vm725_vm12 = vweird.f32 %v1180_v48 }
 0x2c6   : > { %1181 = vrcp.f32 %v692_v50  ;;  %634 = vst.msk [vmem:[%s1375_s6 + $0x4] sm:$0xf] %vm632_vm11, %v629_v51  ;;  %vm726_vm14 = vmor %vm724_vm13, %vm725_vm12  ;;  %v745_v5 = vand.u32 2147483648, %v692_v50  ;;  %vm739_vm1 = vweird.f32 %v692_v50  ;;  %v743_v7 = vand.u32 2147483647, %v692_v50 }
 0x2c7   : > { %v721_v52 = vsub.f32 1.0, %v720_v49 }
 0x2c8   : > { %v746_v9 = vor.u32 1.1754944e-38, %v745_v5  ;;  %vm744_vm3 = vcmp.eq.f32.partialorder %v743_v7, 8.507059e+37 }
 0x2c9   : > { %v722_v53 = vmul.f32 %v1180_v48, %v721_v52 }
 0x2cb   : > { %v723_v1 = vadd.f32 %v1180_v48, %v722_v53 }
 0x2cc   : > { %v1182_v54 = vpop.eup %1181 }
 0x2cd   : > { %v735_v55 = vmul.f32 %v1182_v54, %v692_v50  ;;  %v627_v56 = vpop.permute.xlu0 %626  ;;  %v727_v60 = vsel %vm726_vm14, %v1180_v48, %v723_v1  ;;  %vm740_vm0 = vweird.f32 %v1182_v54  ;;  %v883_v18 = vpop.permute.xlu2 %882 }
 0x2ce   : > { %633 = vst.msk [vmem:[%s1375_s6] sm:$0xf] %vm632_vm11, %v627_v56  ;;  %v732_v2 = vsel %vm729_vm15, %v731_v63, %v727_v60  ;;  %vm741_vm2 = vmor %vm739_vm1, %vm740_vm0 }
 0x2cf   : > { %v736_v57 = vsub.f32 1.0, %v735_v55 }
 0x2d1   : > { %v737_v61 = vmul.f32 %v1182_v54, %v736_v57 }
 0x2d3   : > { %v738_v4 = vadd.f32 %v1182_v54, %v737_v61 }
 0x2d5   : > { %v742_v8 = vsel %vm741_vm2, %v1182_v54, %v738_v4 }
 0x2d6   : > { %v714_v0 = vpop.f32.mrf.mxu3  ;;  %v747_v11 = vsel %vm744_vm3, %v746_v9, %v742_v8 }
 0x2d7   : > { %v733_v3 = vmul.f32 %v732_v2, %v714_v0 }
 0x2d9   : > { %v749_v6 = vpack.c.bf16 %v733_v3, %v733_v3 }
 0x2db   : > { %753 = vrot.lane.b32.xlu1 %v749_v6, %s1224_s27 }
 0x2de   : > { %v716_v10 = vpop.f32.mrf.mxu3 }
 0x2df   : > { %v748_v13 = vmul.f32 %v747_v11, %v716_v10 }
 0x2e1   : > { %v750_v14 = vpack.c.bf16 %v748_v13, %v748_v13 }
 0x2e3   : > { %755 = vrot.lane.b32.xlu0 %v750_v14, %s1224_s27 }
 0x2eb   : > { %880 = vrot.lane.b32.xlu0 %v876_v15, %s1223_s26 }
 0x34d   : > { %v754_v16 = vpop.permute.xlu1 %753 }
 0x34e   : > { %760 = vst.msk [vmem:[%s1375_s6] sm:$0xf] %vm759_vm4, %v754_v16 }
 0x355   : > { %v756_v17 = vpop.permute.xlu0 %755 }
 0x356   : > { %761 = vst.msk [vmem:[%s1375_s6 + $0x4] sm:$0xf] %vm759_vm4, %v756_v17 }
 0x357   : > { %888 = vst.msk [vmem:[%s1375_s6 + $0x4] sm:$0xf] %vm886_vm5, %v883_v18 }
 0x35d   : > { %v881_v19 = vpop.permute.xlu0 %880 }
 0x35e   : > { %887 = vst.msk [vmem:[%s1375_s6] sm:$0xf] %vm886_vm5, %v881_v19 }
 0x35f PF: > { %s13_s16 = sadd.s32 1, %s1221_s16   ;;  %s1411_s12 = smov %s1209_s13 }
 0x360   : > { %p10_p10 = scmp.ge.s32.totalorder %s13_s16, 4   ;;  %s1412_s13 = smov %s1285_s21 }
 0x361   : > { %s1413_s14 = smov %s1217_s15  ;;  %s1414_s15 = smov %s1416_s17 }
 0x362   :  { %12 = sbr.rel (!%p10_p10) target bundleno = 3 (0x3), region = 206 }

</bundles_post_ra>
